<compile_context>
chip_gen: v6e
topology: v6e:2x2x1
jax: 0.10.0
libtpu: 0.0.40
codegen_flags: <defaults>
</compile_context>

<pallas_src>
import functools

import jax
import jax.numpy as jnp
from jax.experimental import pallas as pl
from jax.experimental.pallas import tpu as pltpu

LN_EPS = 1e-5                     # PyTorch nn.LayerNorm default
_INV_SQRT2 = 0.7071067811865476   # 1/sqrt(2) for exact (erf) GELU


def _round_up(n, m):
    return ((n + m - 1) // m) * m


def _tpu_config():
    """Pick (tile_m, tile_h, vmem_limit, K/N alignment) per TPU generation at trace time."""
    vmem_bytes = 64 * 1024 * 1024
    try:
        info = pltpu.get_tpu_info()
        vmem_bytes = int(getattr(info, "vmem_capacity_bytes", vmem_bytes))
    except Exception:
        pass
    if vmem_bytes >= 96 * 1024 * 1024:
        # v5e / v6e: 128 MiB physical VMEM -> large row tiles cross the weight-streaming ridge.
        return dict(tile_m=1024, tile_h=512, vmem_limit=100 * 1024 * 1024, kn_align=256)
    # v7x: 64 MiB per TensorCore -> smaller tiles, leave headroom for compiler scratch.
    return dict(tile_m=512, tile_h=256, vmem_limit=56 * 1024 * 1024, kn_align=256)


def ffn_kernel(x_ref, g_ref, be_ref, w1_ref, b1_ref, w2_ref, b2_ref, o_ref,
               xn_ref, acc_ref=None, *, d_real):
    """Grid = (row_tiles, hidden_tiles). Hidden axis is the reduction ('arbitrary').

    If acc_ref is None the output dtype is f32 and accumulation happens directly in o_ref
    (which is resident across the hidden axis because its index_map ignores k).
    """
    k = pl.program_id(1)
    acc = acc_ref if acc_ref is not None else o_ref

    @pl.when(k == 0)
    def _init():
        # LayerNorm in f32, once per row tile; cache normalized rows in the compute dtype.
        x = x_ref[...].astype(jnp.float32)
        d_pad = x.shape[-1]
        if d_real == d_pad:
            mean = jnp.mean(x, axis=-1, keepdims=True)
            diff = x - mean
            var = jnp.mean(diff * diff, axis=-1, keepdims=True)
        else:
            # Feature axis was zero-padded: mask padded lanes out of the statistics.
            lane = jax.lax.broadcasted_iota(jnp.int32, (1, d_pad), 1)
            mask = (lane < d_real).astype(jnp.float32)
            inv_d = 1.0 / d_real
            mean = jnp.sum(x * mask, axis=-1, keepdims=True) * inv_d
            diff = (x - mean) * mask
            var = jnp.sum(diff * diff, axis=-1, keepdims=True) * inv_d
        xn = diff * jax.lax.rsqrt(var + LN_EPS)
        xn = xn * g_ref[...] + be_ref[...]          # gamma/beta pre-cast to f32, zero-padded
        xn_ref[...] = xn.astype(xn_ref.dtype)
        acc[...] = jnp.zeros_like(acc)

    # Linear(dim -> hidden chunk) + exact (erf) GELU (matches nn.GELU() default).
    h = jnp.dot(xn_ref[...], w1_ref[...], preferred_element_type=jnp.float32)
    h = h + b1_ref[...]
    h = 0.5 * h * (1.0 + jax.lax.erf(h * _INV_SQRT2))

    # Linear(hidden chunk -> dim), accumulated in f32 across hidden chunks.
    acc[...] += jnp.dot(h.astype(w2_ref.dtype), w2_ref[...],
                        preferred_element_type=jnp.float32)

    @pl.when(k == pl.num_programs(1) - 1)
    def _finalize():
        o_ref[...] = (acc[...] + b2_ref[...]).astype(o_ref.dtype)


def feed_forward(x, gamma, beta, w1, b1, w2, b2, *, compute_dtype=jnp.bfloat16,
                 tile_m=None, tile_h=None, vmem_limit_bytes=None):
    """x: (B, S, D); w1: (D, H); w2: (H, D); gamma/beta/b1/b2: per-feature vectors.

    compute_dtype: dtype used for the MXU operands (weights + cached LayerNorm output).
    Accumulation is always f32.  Pass jnp.float32 for bit-faithful f32 matmuls.
    """
    B, S, D = x.shape
    H = w1.shape[1]
    M = B * S

    cfg = _tpu_config()
    tile_m = cfg["tile_m"] if tile_m is None else tile_m
    tile_h = cfg["tile_h"] if tile_h is None else tile_h
    vmem_limit_bytes = cfg["vmem_limit"] if vmem_limit_bytes is None else vmem_limit_bytes
    kn_align = cfg["kn_align"]

    # Sublane granularity for the row axis depends on dtype packing of x.
    itemsize = jnp.dtype(x.dtype).itemsize
    sub = 8 if itemsize >= 4 else (16 if itemsize == 2 else 32)

    m_rounded = _round_up(M, sub)
    tile_m_eff = min(_round_up(tile_m, sub), m_rounded)
    # Guarantee >= 2 row tiles when M allows, so both v7x TensorCores get work.
    if m_rounded >= 2 * sub:
        tile_m_eff = min(tile_m_eff, _round_up((M + 1) // 2, sub))
    m_pad = _round_up(M, tile_m_eff)

    # K/N aligned to the 256-wide MXUs of v6e/v7x.
    d_pad = _round_up(D, kn_align)
    h_rounded = _round_up(H, kn_align)
    tile_h_eff = min(_round_up(tile_h, kn_align), h_rounded)
    h_pad = _round_up(h_rounded, tile_h_eff)

    # --- wrapper-side zero-padding to lane-dense feature slabs + compute-dtype weights ---
    x2 = x.reshape(M, D)
    if (m_pad, d_pad) != (M, D):
        x2 = jnp.pad(x2, ((0, m_pad - M), (0, d_pad - D)))
    g = jnp.pad(gamma.reshape(1, -1).astype(jnp.float32), ((0, 0), (0, d_pad - D)))
    be = jnp.pad(beta.reshape(1, -1).astype(jnp.float32), ((0, 0), (0, d_pad - D)))
    w1p = jnp.pad(w1.astype(compute_dtype), ((0, d_pad - D), (0, h_pad - H)))
    b1p = jnp.pad(b1.reshape(1, -1).astype(jnp.float32), ((0, 0), (0, h_pad - H)))
    w2p = jnp.pad(w2.astype(compute_dtype), ((0, h_pad - H), (0, d_pad - D)))
    b2p = jnp.pad(b2.reshape(1, -1).astype(jnp.float32), ((0, 0), (0, d_pad - D)))

    out_dtype = x.dtype
    # f32 output blocks can serve as the accumulator themselves (saves VMEM on v7x).
    use_acc_scratch = jnp.dtype(out_dtype) != jnp.float32

    scratch_shapes = [pltpu.VMEM((tile_m_eff, d_pad), compute_dtype)]   # cached LayerNorm(x)
    if use_acc_scratch:
        scratch_shapes.append(pltpu.VMEM((tile_m_eff, d_pad), jnp.float32))

    grid = (m_pad // tile_m_eff, h_pad // tile_h_eff)

    out2 = pl.pallas_call(
        functools.partial(ffn_kernel, d_real=D),
        out_shape=jax.ShapeDtypeStruct((m_pad, d_pad), out_dtype),
        grid=grid,
        in_specs=[
            pl.BlockSpec((tile_m_eff, d_pad), lambda i, k: (i, 0)),   # x rows
            pl.BlockSpec((1, d_pad), lambda i, k: (0, 0)),            # LN gamma (f32)
            pl.BlockSpec((1, d_pad), lambda i, k: (0, 0)),            # LN beta  (f32)
            pl.BlockSpec((d_pad, tile_h_eff), lambda i, k: (0, k)),   # W1 chunk (in, hid)
            pl.BlockSpec((1, tile_h_eff), lambda i, k: (0, k)),       # b1 chunk (f32)
            pl.BlockSpec((tile_h_eff, d_pad), lambda i, k: (k, 0)),   # W2 chunk (hid, out)
            pl.BlockSpec((1, d_pad), lambda i, k: (0, 0)),            # b2 (f32)
        ],
        out_specs=pl.BlockSpec((tile_m_eff, d_pad), lambda i, k: (i, 0)),
        scratch_shapes=scratch_shapes,
        compiler_params=pltpu.CompilerParams(
            dimension_semantics=("parallel", "arbitrary"),
            vmem_limit_bytes=vmem_limit_bytes,
        ),
    )(x2, g, be, w1p, b1p, w2p, b2p)

    return out2[:M, :D].reshape(B, S, D)


def reference(x, gamma, beta, w1, b1, w2, b2):
    xf = x.astype(jnp.float32)
    mean = jnp.mean(xf, axis=-1, keepdims=True)
    var = jnp.mean((xf - mean) ** 2, axis=-1, keepdims=True)
    xn = (xf - mean) / jnp.sqrt(var + LN_EPS) * gamma + beta
    h = xn @ w1 + b1
    h = jax.nn.gelu(h, approximate=False)
    return (h @ w2 + b2).astype(x.dtype)


if __name__ == "__main__":
    B, S, DIM, HID = 2, 8, 32, 64

    key = jax.random.PRNGKey(0)
    kx, kw1, kb1, kw2, kb2 = jax.random.split(key, 5)

    x = jax.random.normal(kx, (B, S, DIM), dtype=jnp.float32)

    # Parameters shaped as nn.LayerNorm(dim), nn.Linear(dim, hidden_dim), nn.Linear(hidden_dim, dim).
    # Linear weights are stored as (in_features, out_features) so y = x @ W + b.
    gamma = jnp.ones((1, DIM), dtype=jnp.float32)
    beta = jnp.zeros((1, DIM), dtype=jnp.float32)
    w1 = jax.random.normal(kw1, (DIM, HID), dtype=jnp.float32) * 0.05
    b1 = jax.random.normal(kb1, (1, HID), dtype=jnp.float32) * 0.01
    w2 = jax.random.normal(kw2, (HID, DIM), dtype=jnp.float32) * 0.05
    b2 = jax.random.normal(kb2, (1, DIM), dtype=jnp.float32) * 0.01

    ref = reference(x, gamma, beta, w1, b1, w2, b2)

    # 1) f32 compute path: bit-level validation against the reference.
    out_f32 = feed_forward(x, gamma, beta, w1, b1, w2, b2, compute_dtype=jnp.float32)
    out_f32 = jax.block_until_ready(out_f32)
    assert out_f32.shape == (B, S, DIM)
    assert jnp.allclose(out_f32, ref, atol=1e-5, rtol=1e-5), "f32 path mismatch vs reference"

    # 2) default bf16 compute path (the performance configuration): loose tolerance.
    out_bf16 = feed_forward(x, gamma, beta, w1, b1, w2, b2)
    out_bf16 = jax.block_until_ready(out_bf16)
    assert out_bf16.shape == (B, S, DIM)
    assert jnp.allclose(out_bf16, ref, atol=5e-2, rtol=5e-2), "bf16 path mismatch vs reference"

    print("KERNEL_OK")
</pallas_src>

<mosaic_0001>
module attributes {stable_mosaic.version = 11 : i64} {
  func.func @ffn_kernel(%arg0: i32, %arg1: i32, %arg2: memref<8x256xf32, #tpu.memory_space<vmem>>, %arg3: memref<1x256xf32, #tpu.memory_space<vmem>>, %arg4: memref<1x256xf32, #tpu.memory_space<vmem>>, %arg5: memref<256x256xf32, #tpu.memory_space<vmem>>, %arg6: memref<1x256xf32, #tpu.memory_space<vmem>>, %arg7: memref<256x256xf32, #tpu.memory_space<vmem>>, %arg8: memref<1x256xf32, #tpu.memory_space<vmem>>, %arg9: memref<8x256xf32, #tpu.memory_space<vmem>>, %arg10: memref<8x256xf32, #tpu.memory_space<vmem>>) attributes {dimension_semantics = [#tpu.dimension_semantics<parallel>, #tpu.dimension_semantics<arbitrary>], iteration_bounds = array<i64: 2, 1>, scalar_prefetch = 0 : i64, scratch_operands = 1 : i64, tpu.core_type = #tpu.core_type<tc>, window_params = [{transform_indices = @transform_0, window_bounds = array<i64: 8, 256>}, {pipeline_mode = #tpu.pipeline_mode<synchronous>, transform_indices = @transform_1, window_bounds = array<i64: 1, 256>}, {pipeline_mode = #tpu.pipeline_mode<synchronous>, transform_indices = @transform_2, window_bounds = array<i64: 1, 256>}, {transform_indices = @transform_3, window_bounds = array<i64: 256, 256>}, {transform_indices = @transform_4, window_bounds = array<i64: 1, 256>}, {transform_indices = @transform_5, window_bounds = array<i64: 256, 256>}, {pipeline_mode = #tpu.pipeline_mode<synchronous>, transform_indices = @transform_6, window_bounds = array<i64: 1, 256>}, {transform_indices = @transform_7, window_bounds = array<i64: 8, 256>}]} {
    %c0_i32 = arith.constant 0 : i32
    %0 = arith.cmpi eq, %arg1, %c0_i32 : i32
    %1 = arith.extui %0 : i1 to i32
    %c0_i32_0 = arith.constant 0 : i32
    %2 = arith.cmpi ne, %1, %c0_i32_0 : i32
    scf.if %2 {
      %c0_18 = arith.constant 0 : index
      %c0_19 = arith.constant 0 : index
      %25 = vector.load %arg2[%c0_18, %c0_19] : memref<8x256xf32, #tpu.memory_space<vmem>>, vector<8x256xf32>
      %26 = tpu.iota {dimensions = array<i32: 1>} : vector<1x256xi32>
      %c32_i32 = arith.constant 32 : i32
      %27 = vector.broadcast %c32_i32 : i32 to vector<1x256xi32>
      %28 = arith.cmpi slt, %26, %27 : vector<1x256xi32>
      %29 = arith.extui %28 : vector<1x256xi1> to vector<1x256xi32>
      %30 = arith.sitofp %29 : vector<1x256xi32> to vector<1x256xf32>
      %31 = vector.broadcast %30 : vector<1x256xf32> to vector<8x256xf32>
      %32 = arith.mulf %25, %31 : vector<8x256xf32>
      %cst_20 = arith.constant dense<0.000000e+00> : vector<8xf32>
      %33 = vector.multi_reduction <add>, %32, %cst_20 [1] : vector<8x256xf32> to vector<8xf32>
      %34 = vector.shape_cast %33 : vector<8xf32> to vector<8x1xf32>
      %cst_21 = arith.constant 3.125000e-02 : f32
      %35 = vector.broadcast %cst_21 : f32 to vector<8x1xf32>
      %36 = arith.mulf %34, %35 : vector<8x1xf32>
      %37 = vector.broadcast %36 : vector<8x1xf32> to vector<8x256xf32>
      %38 = arith.subf %25, %37 : vector<8x256xf32>
      %39 = vector.broadcast %30 : vector<1x256xf32> to vector<8x256xf32>
      %40 = arith.mulf %38, %39 : vector<8x256xf32>
      %41 = arith.mulf %40, %40 : vector<8x256xf32>
      %cst_22 = arith.constant dense<0.000000e+00> : vector<8xf32>
      %42 = vector.multi_reduction <add>, %41, %cst_22 [1] : vector<8x256xf32> to vector<8xf32>
      %43 = vector.shape_cast %42 : vector<8xf32> to vector<8x1xf32>
      %cst_23 = arith.constant 3.125000e-02 : f32
      %44 = vector.broadcast %cst_23 : f32 to vector<8x1xf32>
      %45 = arith.mulf %43, %44 : vector<8x1xf32>
      %cst_24 = arith.constant 9.99999974E-6 : f32
      %46 = vector.broadcast %cst_24 : f32 to vector<8x1xf32>
      %47 = arith.addf %45, %46 : vector<8x1xf32>
      %48 = math.rsqrt %47 : vector<8x1xf32>
      %49 = vector.broadcast %48 : vector<8x1xf32> to vector<8x256xf32>
      %50 = arith.mulf %40, %49 : vector<8x256xf32>
      %c0_25 = arith.constant 0 : index
      %c0_26 = arith.constant 0 : index
      %51 = vector.load %arg3[%c0_25, %c0_26] : memref<1x256xf32, #tpu.memory_space<vmem>>, vector<1x256xf32>
      %52 = vector.broadcast %51 : vector<1x256xf32> to vector<8x256xf32>
      %53 = arith.mulf %50, %52 : vector<8x256xf32>
      %c0_27 = arith.constant 0 : index
      %c0_28 = arith.constant 0 : index
      %54 = vector.load %arg4[%c0_27, %c0_28] : memref<1x256xf32, #tpu.memory_space<vmem>>, vector<1x256xf32>
      %55 = vector.broadcast %54 : vector<1x256xf32> to vector<8x256xf32>
      %56 = arith.addf %53, %55 : vector<8x256xf32>
      %c0_29 = arith.constant 0 : index
      %c0_30 = arith.constant 0 : index
      %57 = vector.load %arg10[%c0_29, %c0_30] : memref<8x256xf32, #tpu.memory_space<vmem>>, vector<8x256xf32>
      tpu.vector_store %arg10[%c0_29, %c0_30], %56 {strides = array<i32>} : memref<8x256xf32, #tpu.memory_space<vmem>>, vector<8x256xf32>,
      %cst_31 = arith.constant 0.000000e+00 : f32
      %58 = vector.broadcast %cst_31 : f32 to vector<8x256xf32>
      %c0_32 = arith.constant 0 : index
      %c0_33 = arith.constant 0 : index
      %59 = vector.load %arg9[%c0_32, %c0_33] : memref<8x256xf32, #tpu.memory_space<vmem>>, vector<8x256xf32>
      tpu.vector_store %arg9[%c0_32, %c0_33], %58 {strides = array<i32>} : memref<8x256xf32, #tpu.memory_space<vmem>>, vector<8x256xf32>,
    } else {
    }
    %c0 = arith.constant 0 : index
    %c0_1 = arith.constant 0 : index
    %3 = vector.load %arg10[%c0, %c0_1] : memref<8x256xf32, #tpu.memory_space<vmem>>, vector<8x256xf32>
    %c0_2 = arith.constant 0 : index
    %c0_3 = arith.constant 0 : index
    %4 = vector.load %arg5[%c0_2, %c0_3] : memref<256x256xf32, #tpu.memory_space<vmem>>, vector<256x256xf32>
    %cst = arith.constant dense<0.000000e+00> : vector<8x256xf32>
    %5 = tpu.matmul %3, %4, %cst {dimension_numbers = #tpu.dot_dimension_numbers<[1], [0], [0], [1], [0, 0, 1, 1], [], []>} : vector<8x256xf32>, vector<256x256xf32>, vector<8x256xf32> -> vector<8x256xf32>
    %c0_4 = arith.constant 0 : index
    %c0_5 = arith.constant 0 : index
    %6 = vector.load %arg6[%c0_4, %c0_5] : memref<1x256xf32, #tpu.memory_space<vmem>>, vector<1x256xf32>
    %7 = vector.broadcast %6 : vector<1x256xf32> to vector<8x256xf32>
    %8 = arith.addf %5, %7 : vector<8x256xf32>
    %cst_6 = arith.constant 5.000000e-01 : f32
    %9 = vector.broadcast %cst_6 : f32 to vector<8x256xf32>
    %10 = arith.mulf %9, %8 : vector<8x256xf32>
    %cst_7 = arith.constant 0.707106769 : f32
    %11 = vector.broadcast %cst_7 : f32 to vector<8x256xf32>
    %12 = arith.mulf %8, %11 : vector<8x256xf32>
    %13 = math.erf %12 : vector<8x256xf32>
    %cst_8 = arith.constant 1.000000e+00 : f32
    %14 = vector.broadcast %cst_8 : f32 to vector<8x256xf32>
    %15 = arith.addf %14, %13 : vector<8x256xf32>
    %16 = arith.mulf %10, %15 : vector<8x256xf32>
    %c0_9 = arith.constant 0 : index
    %c0_10 = arith.constant 0 : index
    %17 = vector.load %arg9[%c0_9, %c0_10] : memref<8x256xf32, #tpu.memory_space<vmem>>, vector<8x256xf32>
    %c0_11 = arith.constant 0 : index
    %c0_12 = arith.constant 0 : index
    %18 = vector.load %arg7[%c0_11, %c0_12] : memref<256x256xf32, #tpu.memory_space<vmem>>, vector<256x256xf32>
    %cst_13 = arith.constant dense<0.000000e+00> : vector<8x256xf32>
    %19 = tpu.matmul %16, %18, %cst_13 {dimension_numbers = #tpu.dot_dimension_numbers<[1], [0], [0], [1], [0, 0, 1, 1], [], []>} : vector<8x256xf32>, vector<256x256xf32>, vector<8x256xf32> -> vector<8x256xf32>
    %20 = arith.addf %17, %19 : vector<8x256xf32>
    %c0_14 = arith.constant 0 : index
    %c0_15 = arith.constant 0 : index
    %21 = vector.load %arg9[%c0_14, %c0_15] : memref<8x256xf32, #tpu.memory_space<vmem>>, vector<8x256xf32>
    tpu.vector_store %arg9[%c0_14, %c0_15], %20 {strides = array<i32>} : memref<8x256xf32, #tpu.memory_space<vmem>>, vector<8x256xf32>,
    %c0_i32_16 = arith.constant 0 : i32
    %22 = arith.cmpi eq, %arg1, %c0_i32_16 : i32
    %23 = arith.extui %22 : i1 to i32
    %c0_i32_17 = arith.constant 0 : i32
    %24 = arith.cmpi ne, %23, %c0_i32_17 : i32
    scf.if %24 {
      %c0_18 = arith.constant 0 : index
      %c0_19 = arith.constant 0 : index
      %25 = vector.load %arg9[%c0_18, %c0_19] : memref<8x256xf32, #tpu.memory_space<vmem>>, vector<8x256xf32>
      %c0_20 = arith.constant 0 : index
      %c0_21 = arith.constant 0 : index
      %26 = vector.load %arg8[%c0_20, %c0_21] : memref<1x256xf32, #tpu.memory_space<vmem>>, vector<1x256xf32>
      %27 = vector.broadcast %26 : vector<1x256xf32> to vector<8x256xf32>
      %28 = arith.addf %25, %27 : vector<8x256xf32>
      %c0_22 = arith.constant 0 : index
      %c0_23 = arith.constant 0 : index
      %29 = vector.load %arg9[%c0_22, %c0_23] : memref<8x256xf32, #tpu.memory_space<vmem>>, vector<8x256xf32>
      tpu.vector_store %arg9[%c0_22, %c0_23], %28 {strides = array<i32>} : memref<8x256xf32, #tpu.memory_space<vmem>>, vector<8x256xf32>,
    } else {
    }
    return
  }
  func.func @transform_0(%arg0: i32, %arg1: i32) -> (i32, i32) {
    %c0_i32 = arith.constant 0 : i32
    %c0_i32_0 = arith.constant 0 : i32
    return %arg0, %c0_i32 : i32, i32
  }
  func.func @transform_1(%arg0: i32, %arg1: i32) -> (i32, i32) {
    %c0_i32 = arith.constant 0 : i32
    %c0_i32_0 = arith.constant 0 : i32
    %c0_i32_1 = arith.constant 0 : i32
    return %c0_i32, %c0_i32_0 : i32, i32
  }
  func.func @transform_2(%arg0: i32, %arg1: i32) -> (i32, i32) {
    %c0_i32 = arith.constant 0 : i32
    %c0_i32_0 = arith.constant 0 : i32
    %c0_i32_1 = arith.constant 0 : i32
    return %c0_i32, %c0_i32_0 : i32, i32
  }
  func.func @transform_3(%arg0: i32, %arg1: i32) -> (i32, i32) {
    %c0_i32 = arith.constant 0 : i32
    %c0_i32_0 = arith.constant 0 : i32
    return %c0_i32, %arg1 : i32, i32
  }
  func.func @transform_4(%arg0: i32, %arg1: i32) -> (i32, i32) {
    %c0_i32 = arith.constant 0 : i32
    %c0_i32_0 = arith.constant 0 : i32
    return %c0_i32, %arg1 : i32, i32
  }
  func.func @transform_5(%arg0: i32, %arg1: i32) -> (i32, i32) {
    %c0_i32 = arith.constant 0 : i32
    %c0_i32_0 = arith.constant 0 : i32
    return %arg1, %c0_i32 : i32, i32
  }
  func.func @transform_6(%arg0: i32, %arg1: i32) -> (i32, i32) {
    %c0_i32 = arith.constant 0 : i32
    %c0_i32_0 = arith.constant 0 : i32
    %c0_i32_1 = arith.constant 0 : i32
    return %c0_i32, %c0_i32_0 : i32, i32
  }
  func.func @transform_7(%arg0: i32, %arg1: i32) -> (i32, i32) {
    %c0_i32 = arith.constant 0 : i32
    %c0_i32_0 = arith.constant 0 : i32
    return %arg0, %c0_i32 : i32, i32
  }
}

</mosaic_0001>

<bundles_post_ra>
// kernel: tpu_custom_call.1
= control target key start
LH: loop header
LB: loop body
LE: loop exit
PB: predicated region body
PF: predicated region fallthrough
CT: control target
= control target key end

     0   :  { %s1519_s0 = inlined_call_operand.hbm [shape: f32[16,256], index: 0, kind: input, shape index: {}]   ;;  %s1520_s1 = inlined_call_operand.hbm [shape: f32[1,256], index: 1, kind: input, shape index: {}]   ;;  %s1521_s2 = inlined_call_operand.vmem [shape: f32[1,256], index: 2, kind: input, shape index: {}]   ;;  %s1522_s3 = inlined_call_operand.hbm [shape: f32[256,256], index: 3, kind: input, shape index: {}]   ;;  %s1523_s4 = inlined_call_operand.vmem [shape: f32[1,256], index: 4, kind: input, shape index: {}]   ;;  %s1524_s5 = inlined_call_operand.hbm [shape: f32[256,256], index: 5, kind: input, shape index: {}]   ;;  %s1525_s6 = inlined_call_operand.vmem [shape: f32[1,256], index: 6, kind: input, shape index: {}]   ;;  %s1526_s7 = inlined_call_operand.hbm [shape: f32[16,256], index: 7, kind: output, shape index: {}]  }
   0x1   :  { %1531 = sst [smem:[#allocation16_spill]] %s1520_s1 }
   0x2   :  { %1532 = sst [smem:[#allocation17_spill]] %s1522_s3 }
   0x3   :  { %1533 = sst [smem:[#allocation18_spill]] %s1524_s5 }
   0x4   :  { %12 = vsyncpa [#allocation4], 0 }
   0x5   :  { %14 = vsyncpa [#allocation4 + $0x1], 0 }
   0x6   :  { %15 = vsyncpa [#allocation7], 0 }
   0x7   :  { %16 = vsyncpa [#allocation10], 0 }
   0x8   :  { %17 = vsyncpa [#allocation5], 0 }
   0x9   :  { %19 = vsyncpa [#allocation5 + $0x1], 0  ;;  %s1284_s24 = smov 0   ;;  %s1286_s25 = smov 0  }
   0xa   :  { %s1288_s26 = smov 0   ;;  %s1290_s27 = smov 0  }
   0xb   :  { %s1292_s28 = smov 0   ;;  %s1294_s29 = smov 0  }
   0xc LB: > { %s913_s30 = sadd.s32 4294967295, %s1234_s29   ;;  %s914_s8 = sadd.s32 4294967294, %s1234_s29   ;;  %s1234_s29 = sphi %s1294_s29, %s25_s29   ;;  %s1230_s28 = sphi %s1292_s28, %s1555_s28   ;;  %s1226_s27 = sphi %s1290_s27, %s1554_s27   ;;  %s1222_s26 = sphi %s1288_s26, %s1553_s26   ;;  %s1218_s25 = sphi %s1286_s25, %s1552_s25   ;;  %s1214_s24 = sphi %s1284_s24, %s1551_s24  }
   0xd   : > { %p57_p0 = scmp.ne.s32.totalorder %s1218_s25, %s1214_s24  ;;  %p1318_p1 = scmp.eq.s32.totalorder %s913_s30, 0 }
   0xe   : > { %p1322_p2 = scmp.eq.s32.totalorder %s913_s30, 1  ;;  %p228_p3 = scmp.eq.s32.totalorder %s914_s8, 1 }
   0xf   : > { %s1534_s9 = scalar_select %p1318_p1, 1, 0 }
  0x10   : > { %s1535_s10 = scalar_select %p1322_p2, 1, 0 }
  0x11   : > { %p1328_p4 = por %p1318_p1, %p57_p0  ;;  %p915_p5 = scmp.ge.s32.totalorder %s1234_s29, 1 }
  0x12   : > { %p1333_p6 = por %p228_p3, %p57_p0  ;;  %p235_p7 = scmp.lt.s32.totalorder %s1234_s29, 3 }
  0x13   : > { %s1536_s11 = scalar_select %p1328_p4, 1, 0 }
  0x14   : > { %s1537_s12 = scalar_select %p1333_p6, 1, 0 }
  0x15   : > { %p1338_p8 = pnand %p915_p5, %p235_p7  ;;  %s1236_s14 = smov [#allocation6]  }
  0x16   : > { %s248_s15 = sshll.u32 %s1236_s14, 4  ;;  %s1237_s16 = smov [#allocation8]   ;;  %s249_s15 = int_to_ptr.vmem [resolvable:$true] %s248_s15 }
  0x17   : > { %s1538_s13 = scalar_select %p1338_p8, 1, 0 }
  0x18   : > { %p954_p10 = pneg %p1338_p8  ;;  %s264_s17 = sshll.u32 %s1237_s16, 4  ;;  %s265_s17 = int_to_ptr.vmem [resolvable:$true] %s264_s17 }
  0x19   : > { %s1238_s19 = smov [#allocation9]   ;;  %s1051_s21 = scalar_lea.vmem %s249_s15, 32 }
  0x1a   : > { %p1347_p11 = pnand %p954_p10, %p1318_p1  ;;  %s289_s20 = sshll.u32 %s1238_s19, 4  ;;  %s290_s20 = int_to_ptr.vmem [resolvable:$true] %s289_s20 }
  0x1b   : > { %p1052_p13 = scmp.ne.s32.totalorder %s249_s15, %s1051_s21  ;;  %p1059_p5 = scmp.lt.s32.totalorder %s249_s15, %s249_s15 }
  0x1c   : > { %p1042_p12 = pneg %p1347_p11  ;;  %p1060_p7 = scmp.lt.s32.totalorder %s1051_s21, %s1051_s21 }
  0x1e   : > { %p1054_p0 = pnand %p1052_p13, %p1042_p12  ;;  %p1061_p9 = por %p1060_p7, %p1059_p5 }
  0x20   : > { %p1055_p3 = pneg %p1054_p0 }
  0x22   : > { %p1062_p10 = pnand %p1061_p9, %p1055_p3 }
  0x24   : > { %1065 = shalt.err (!%p1062_p10)
}
  0x25   : > { %s1540_s1 = sld [smem:[#allocation16_spill]]  ;;  %s1077_s30 = scalar_lea.vmem %s265_s17, 8192 }
  0x26   : > { %p1078_p6 = scmp.ne.s32.totalorder %s265_s17, %s1077_s30  ;;  %p1085_p13 = scmp.lt.s32.totalorder %s265_s17, %s265_s17 }
  0x27   : > { %p1086_p0 = scmp.lt.s32.totalorder %s1077_s30, %s1077_s30 }
  0x28   : > { %p1080_p1 = pnand %p1078_p6, %p1042_p12 }
  0x29   : > { %p1087_p8 = por %p1086_p0, %p1085_p13 }
  0x2a   : > { %p1081_p4 = pneg %p1080_p1 }
  0x2b   : > { %957 = dma.hbm_to_vmem [thread:$0]  (!%p1347_p11), %s1540_s1, 32, %s249_s15, [#allocation7]  }
  0x2c   : > { %p1088_p2 = pnand %p1087_p8, %p1081_p4 }
  0x2e   : > { %1091 = shalt.err (!%p1088_p2)
}
  0x2f   : > { %s1239_s8 = smov 256   ;;  %s1240_s14 = smov 16  }
  0x30   : > { %s1541_s3 = sld [smem:[#allocation17_spill]]  ;;  %s1103_s15 = scalar_lea.vmem %s290_s20, 8192 }
  0x31   : > { %p1104_p9 = scmp.ne.s32.totalorder %s290_s20, %s1103_s15  ;;  %p1111_p3 = scmp.lt.s32.totalorder %s290_s20, %s290_s20 }
  0x32   : > { %p1112_p5 = scmp.lt.s32.totalorder %s1103_s15, %s1103_s15 }
  0x33   : > { %p1106_p1 = pnand %p1104_p9, %p1042_p12 }
  0x34   : > { %p1113_p4 = por %p1112_p5, %p1111_p3 }
  0x35   : > { %p1107_p6 = pneg %p1106_p1 }
  0x36   : > { %960 = dma.hbm_to_vmem [thread:$0]  (!%p1347_p11), %s1541_s3, 8192, %s265_s17, [#allocation7], %s1239_s8, %s1239_s8, %s1240_s14  }
  0x37   : > { %p1114_p2 = pnand %p1113_p4, %p1107_p6 }
  0x39   : > { %1117 = shalt.err (!%p1114_p2)
}
  0x3a   : > { %s1542_s5 = sld [smem:[#allocation18_spill]]  ;;  %s44_s17 = sadd.s32 1, %s1222_s26 }
  0x3b   : > { %s37_s23 = sadd.s32 1, %s1230_s28  ;;  %p51_p8 = scmp.ne.s32.totalorder %s1222_s26, %s1218_s25 }
  0x3c   : > { %p39_p12 = scmp.ge.s32.totalorder %s37_s23, 2  ;;  %p52_p7 = scmp.eq.s32.totalorder %s1234_s29, 0 }
  0x3d   : > { %p1543_p10 = scmp.ne.s32.totalorder %s1535_s10, 0  ;;  %p975_p0 = scmp.lt.s32.totalorder %s1234_s29, 2 }
  0x3e   : > { %s1557_s23 = smov (%p39_p12, %s37_s23), 0  ;;  %p53_p9 = por %p52_p7, %p51_p8 }
  0x3f   : > { %p1384_p13 = por %p1543_p10, %p51_p8  ;;  %s306_s30 = sand.u32 1, %s1222_s26  }
  0x40   : > { %963 = dma.hbm_to_vmem [thread:$0]  (!%p1347_p11), %s1542_s5, 8192, %s290_s20, [#allocation10], %s1239_s8, %s1239_s8, %s1240_s14  }
  0x41   : > { %s41_s16 = ssub.s32 %s1230_s28, %s1557_s23  ;;  %s921_s20 = sshll.u32 %s306_s30, 4 }
  0x42   : > { %p42_p1 = scmp.eq.s32.totalorder %s41_s16, 0  ;;  %s936_s8 = sshll.u32 %s1230_s28, 8 }
  0x43   : > { %s316_s10 = scalar_lea.hbm %s1519_s0, %s936_s8  ;;  %s310_s21 = scalar_lea.vmem [#allocation3], %s921_s20 }
  0x44   : > { %s1396_s14 = scalar_select %p42_p1, %s1222_s26, %s44_s17  }
  0x45   : > { %s318_s22 = sshll.u32 %s310_s21, 4  ;;  %p1403_p11 = pnand %p975_p0, %p53_p9  ;;  %s319_s22 = int_to_ptr.vmem [resolvable:$true] %s318_s22 }
  0x46   : > { %s307_s3 = scalar_lea.sflag [#allocation4], %s306_s30  ;;  %s1131_s16 = scalar_lea.vmem %s319_s22, 256 }
  0x47   : > { %p1120_p6 = pneg %p1403_p11  ;;  %p1132_p3 = scmp.ne.s32.totalorder %s319_s22, %s1131_s16 }
  0x48   : > { %s1241_s17 = smov [#allocation3]  }
  0x49   : > { %p1134_p5 = pnand %p1132_p3, %p1120_p6  ;;  %s1136_s5 = sshll.u32 %s1241_s17, 4  ;;  %s1137_s5 = int_to_ptr.vmem [resolvable:$false] %s1136_s5 }
  0x4a   : > { %s1138_s8 = scalar_lea.vmem %s1137_s5, 512  ;;  %p1139_p2 = scmp.lt.s32.totalorder %s319_s22, %s1137_s5 }
  0x4b   : > { %p1135_p4 = pneg %p1134_p5  ;;  %p1140_p8 = scmp.lt.s32.totalorder %s1138_s8, %s1131_s16 }
  0x4d   : > { %p1141_p12 = por %p1140_p8, %p1139_p2 }
  0x4f   : > { %p1142_p7 = pnand %p1141_p12, %p1135_p4 }
  0x51   : > { %1145 = shalt.err (!%p1142_p7)
}
  0x52   : > { %967 = dma.hbm_to_vmem [thread:$0]  (!%p1403_p11), %s316_s10, 256, %s319_s22, %s307_s3  }
  0x53   : > { %p1546_p10 = scmp.ne.s32.totalorder %s1538_s13, 0 }
  0x54   : > { %s1414_s30 = sand.u32 (!%p1546_p10), 1, %s1218_s25   ;;  %p1547_p0 = scmp.ne.s32.totalorder (!%p1546_p10), %s1536_s11, 0 }
  0x55   : > { %327 = sbr.rel (%p1546_p10) target bundleno = 845 (0x34d), region = 48  ;;  %s925_s20 = sshll.u32 (!%p1546_p10), %s1414_s30, 4 }
  0x56   : > { %s330_s19 = scalar_lea.sflag (!%p1546_p10), [#allocation4], %s1414_s30  ;;  %s333_s5 = scalar_lea.vmem (!%p1546_p10), [#allocation3], %s925_s20 }
  0x5a   : > { %1197 = dma.done.wait (%p1547_p0), %s330_s19, 256  }
  0x5b   : > { %1199 = vsyncadd (%p1547_p0), %s330_s19, 4294967040  ;;  %p1548_p9 = scmp.ne.s32.totalorder %s1534_s9, 0 }
  0x5d   : > { %1201 = dma.done.wait (%p1548_p9), [#allocation7], 8224  }
  0x5e   : > { %1203 = vsyncadd (%p1548_p9), [#allocation7], 4294959072 }
  0x5f   : > { %1205 = dma.done.wait (%p1548_p9), [#allocation10], 8192  }
  0x60   : > { %1207 = vsyncadd (%p1548_p9), [#allocation10], 4294959104  ;;  %v393_v0 = vlaneseq  ;;  %v1242_v2 = vmov 0.0   ;;  %v1435_v4 = vld [vmem:[%s333_s5] sm:$0xff]  ;;  %v1437_v5 = vld [vmem:[%s333_s5 + $0x8] sm:$0xff]  ;;  %s937_s10 = sshll.u32 %s1226_s27, 8 }
  0x61   : > { %v403_v7 = vmul.f32 0.0, %v1437_v5  ;;  %v487_v9 = vld [vmem:[#allocation8 + $0xf8] sm:$0xff]  ;;  %v486_v10 = vld [vmem:[#allocation8 + $0xf0] sm:$0xff]  ;;  %v485_v11 = vld [vmem:[#allocation8 + $0xe8] sm:$0xff]  ;;  %s379_s21 = scalar_lea.vmem [#allocation11], %s925_s20  ;;  %s788_s8 = scalar_lea.hbm %s1526_s7, %s937_s10 }
  0x62   : > { %v394_v1 = vand.u32 127, %v393_v0  ;;  %532 = vmatprep.subr.mxu0 %v487_v9  ;;  %v484_v12 = vld [vmem:[#allocation8 + $0xe0] sm:$0xff]  ;;  %v483_v13 = vld [vmem:[#allocation8 + $0xd8] sm:$0xff]  ;;  %v482_v14 = vld [vmem:[#allocation8 + $0xd0] sm:$0xff]  ;;  %s790_s22 = sshll.u32 %s379_s21, 4  ;;  %s776_s19 = scalar_lea.sflag [#allocation5], %s1414_s30  ;;  %s791_s22 = int_to_ptr.vmem [resolvable:$true] %s790_s22 }
  0x63   : > { %533 = vmatpush1.msra.mxu0 %v486_v10  ;;  %v481_v15 = vld [vmem:[#allocation8 + $0xc8] sm:$0xff]  ;;  %v480_v16 = vld [vmem:[#allocation8 + $0xc0] sm:$0xff]  ;;  %v479_v17 = vld [vmem:[#allocation8 + $0xb8] sm:$0xff]  ;;  %s1146_s5 = scalar_lea.vmem %s791_s22, 256  ;;  %s1243_s1 = smov [#allocation11]  }
  0x64   : > { %vm396_vm0 = vcmp.lt.s32.totalorder %v394_v1, 32  ;;  %534 = vmatprep.subr.mxu0 %v485_v11  ;;  %v478_v18 = vld [vmem:[#allocation8 + $0xb0] sm:$0xff]  ;;  %v477_v19 = vld [vmem:[#allocation8 + $0xa8] sm:$0xff]  ;;  %v476_v20 = vld [vmem:[#allocation8 + $0xa0] sm:$0xff]  ;;  %p1147_p1 = scmp.ne.s32.totalorder %s791_s22, %s1146_s5  ;;  %s1150_s27 = sshll.u32 %s1243_s1, 4  ;;  %s1151_s27 = int_to_ptr.vmem [resolvable:$false] %s1150_s27 }
  0x65   : > { %v1433_v3 = vsel %vm396_vm0, 1.0, %v1242_v2  ;;  %535 = vmatpush1.msra.mxu0 %v484_v12  ;;  %v475_v21 = vld [vmem:[#allocation8 + $0x98] sm:$0xff]  ;;  %v474_v22 = vld [vmem:[#allocation8 + $0x90] sm:$0xff]  ;;  %v473_v23 = vld [vmem:[#allocation8 + $0x88] sm:$0xff]  ;;  %s1152_s20 = scalar_lea.vmem %s1151_s27, 512  ;;  %p1153_p3 = scmp.lt.s32.totalorder %s791_s22, %s1151_s27 }
  0x66   : > { %v402_v6 = vmul.f32 %v1433_v3, %v1435_v4  ;;  %536 = vmatprep.subr.mxu0 %v483_v13  ;;  %v472_v24 = vld [vmem:[#allocation8 + $0x80] sm:$0xff]  ;;  %v471_v25 = vld [vmem:[#allocation8 + $0x78] sm:$0xff]  ;;  %v470_v26 = vld [vmem:[#allocation8 + $0x70] sm:$0xff]  ;;  %p1148_p11 = pnand %p1147_p1, %p1384_p13  ;;  %p1154_p5 = scmp.lt.s32.totalorder %s1152_s20, %s1146_s5 }
  0x67   : > { %537 = vmatpush1.msra.mxu0 %v482_v14  ;;  %v469_v27 = vld [vmem:[#allocation8 + $0x68] sm:$0xff]  ;;  %v468_v28 = vld [vmem:[#allocation8 + $0x60] sm:$0xff]  ;;  %v467_v29 = vld [vmem:[#allocation8 + $0x58] sm:$0xff] }
  0x68   : > { %v404_v8 = vadd.f32 %v403_v7, %v402_v6  ;;  %538 = vmatprep.subr.mxu0 %v481_v15  ;;  %v466_v30 = vld [vmem:[#allocation8 + $0x50] sm:$0xff]  ;;  %v465_v31 = vld [vmem:[#allocation8 + $0x48] sm:$0xff]  ;;  %v464_v32 = vld [vmem:[#allocation8 + $0x40] sm:$0xff]  ;;  %p1149_p6 = pneg %p1148_p11  ;;  %p1155_p4 = por %p1154_p5, %p1153_p3 }
  0x69   : > { %539 = vmatpush1.msra.mxu0 %v480_v16  ;;  %v463_v33 = vld [vmem:[#allocation8 + $0x38] sm:$0xff]  ;;  %v462_v34 = vld [vmem:[#allocation8 + $0x30] sm:$0xff]  ;;  %v461_v35 = vld [vmem:[#allocation8 + $0x28] sm:$0xff] }
  0x6a   : > { %405 = vadd.xlane.f32.xlu0 %v404_v8  ;;  %540 = vmatprep.subr.mxu0 %v479_v17  ;;  %v460_v36 = vld [vmem:[#allocation8 + $0x20] sm:$0xff]  ;;  %v459_v37 = vld [vmem:[#allocation8 + $0x18] sm:$0xff]  ;;  %v458_v38 = vld [vmem:[#allocation8 + $0x10] sm:$0xff]  ;;  %p1156_p2 = pnand %p1155_p4, %p1149_p6 }
  0x6b   : > { %541 = vmatpush1.msra.mxu0 %v478_v18  ;;  %v457_v39 = vld [vmem:[#allocation8 + $0x8] sm:$0xff]  ;;  %v456_v40 = vld [vmem:[#allocation8] sm:$0xff]  ;;  %v519_v41 = vld [vmem:[#allocation8 + $0x1f8] sm:$0xff] }
  0x6c   : > { %542 = vmatprep.subr.mxu0 %v477_v19  ;;  %v518_v42 = vld [vmem:[#allocation8 + $0x1f0] sm:$0xff]  ;;  %v517_v43 = vld [vmem:[#allocation8 + $0x1e8] sm:$0xff]  ;;  %v516_v44 = vld [vmem:[#allocation8 + $0x1e0] sm:$0xff] }
  0x6d   : > { %543 = vmatpush1.msra.mxu0 %v476_v20  ;;  %v515_v45 = vld [vmem:[#allocation8 + $0x1d8] sm:$0xff]  ;;  %v514_v46 = vld [vmem:[#allocation8 + $0x1d0] sm:$0xff]  ;;  %v513_v47 = vld [vmem:[#allocation8 + $0x1c8] sm:$0xff] }
  0x6e   : > { %544 = vmatprep.subr.mxu0 %v475_v21  ;;  %v512_v57 = vld [vmem:[#allocation8 + $0x1c0] sm:$0xff]  ;;  %v511_v58 = vld [vmem:[#allocation8 + $0x1b8] sm:$0xff]  ;;  %v510_v59 = vld [vmem:[#allocation8 + $0x1b0] sm:$0xff] }
  0x6f   : > { %545 = vmatpush1.msra.mxu0 %v474_v22  ;;  %v509_v60 = vld [vmem:[#allocation8 + $0x1a8] sm:$0xff]  ;;  %v508_v61 = vld [vmem:[#allocation8 + $0x1a0] sm:$0xff]  ;;  %v507_v62 = vld [vmem:[#allocation8 + $0x198] sm:$0xff] }
  0x70   : > { %546 = vmatprep.subr.mxu0 %v473_v23  ;;  %v506_v63 = vld [vmem:[#allocation8 + $0x190] sm:$0xff]  ;;  %v505_v1 = vld [vmem:[#allocation8 + $0x188] sm:$0xff]  ;;  %v504_v2 = vld [vmem:[#allocation8 + $0x180] sm:$0xff] }
  0x71   : > { %547 = vmatpush1.msra.mxu0 %v472_v24  ;;  %v500_v6 = vld [vmem:[#allocation8 + $0x160] sm:$0xff]  ;;  %v499_v7 = vld [vmem:[#allocation8 + $0x158] sm:$0xff]  ;;  %v498_v8 = vld [vmem:[#allocation8 + $0x150] sm:$0xff] }
  0x72   : > { %548 = vmatprep.subr.mxu0 %v471_v25  ;;  %v497_v9 = vld [vmem:[#allocation8 + $0x148] sm:$0xff]  ;;  %v496_v10 = vld [vmem:[#allocation8 + $0x140] sm:$0xff]  ;;  %v495_v11 = vld [vmem:[#allocation8 + $0x138] sm:$0xff] }
  0x73   : > { %549 = vmatpush1.msra.mxu0 %v470_v26  ;;  %v494_v12 = vld [vmem:[#allocation8 + $0x130] sm:$0xff]  ;;  %v493_v13 = vld [vmem:[#allocation8 + $0x128] sm:$0xff]  ;;  %v492_v14 = vld [vmem:[#allocation8 + $0x120] sm:$0xff] }
  0x74   : > { %550 = vmatprep.subr.mxu0 %v469_v27  ;;  %v491_v15 = vld [vmem:[#allocation8 + $0x118] sm:$0xff]  ;;  %v490_v16 = vld [vmem:[#allocation8 + $0x110] sm:$0xff]  ;;  %v489_v17 = vld [vmem:[#allocation8 + $0x108] sm:$0xff] }
  0x75   : > { %551 = vmatpush1.msra.mxu0 %v468_v28  ;;  %v488_v18 = vld [vmem:[#allocation8 + $0x100] sm:$0xff]  ;;  %v646_v19 = vld [vmem:[#allocation9 + $0xf8] sm:$0xff]  ;;  %v645_v20 = vld [vmem:[#allocation9 + $0xf0] sm:$0xff] }
  0x76   : > { %552 = vmatprep.subr.mxu0 %v467_v29  ;;  %v644_v21 = vld [vmem:[#allocation9 + $0xe8] sm:$0xff]  ;;  %679 = vmatprep.subr.mxu1 %v646_v19  ;;  %v643_v22 = vld [vmem:[#allocation9 + $0xe0] sm:$0xff]  ;;  %v642_v23 = vld [vmem:[#allocation9 + $0xd8] sm:$0xff] }
  0x77   : > { %553 = vmatpush1.msra.mxu0 %v466_v30  ;;  %680 = vmatpush1.msra.mxu1 %v645_v20  ;;  %v641_v24 = vld [vmem:[#allocation9 + $0xd0] sm:$0xff]  ;;  %v640_v25 = vld [vmem:[#allocation9 + $0xc8] sm:$0xff]  ;;  %v639_v26 = vld [vmem:[#allocation9 + $0xc0] sm:$0xff] }
  0x78   : > { %554 = vmatprep.subr.mxu0 %v465_v31  ;;  %681 = vmatprep.subr.mxu1 %v644_v21  ;;  %v638_v27 = vld [vmem:[#allocation9 + $0xb8] sm:$0xff]  ;;  %v637_v28 = vld [vmem:[#allocation9 + $0xb0] sm:$0xff]  ;;  %v636_v29 = vld [vmem:[#allocation9 + $0xa8] sm:$0xff] }
  0x79   : > { %555 = vmatpush1.msra.mxu0 %v464_v32  ;;  %682 = vmatpush1.msra.mxu1 %v643_v22  ;;  %v635_v30 = vld [vmem:[#allocation9 + $0xa0] sm:$0xff]  ;;  %v634_v31 = vld [vmem:[#allocation9 + $0x98] sm:$0xff]  ;;  %v633_v32 = vld [vmem:[#allocation9 + $0x90] sm:$0xff] }
  0x7a   : > { %556 = vmatprep.subr.mxu0 %v463_v33  ;;  %683 = vmatprep.subr.mxu1 %v642_v23  ;;  %v632_v33 = vld [vmem:[#allocation9 + $0x88] sm:$0xff]  ;;  %v666_v19 = vld [vmem:[#allocation9 + $0x198] sm:$0xff]  ;;  %v663_v21 = vld [vmem:[#allocation9 + $0x180] sm:$0xff] }
  0x7b   : > { %557 = vmatpush1.msra.mxu0 %v462_v34  ;;  %684 = vmatpush1.msra.mxu1 %v641_v24  ;;  %v631_v34 = vld [vmem:[#allocation9 + $0x80] sm:$0xff]  ;;  %v664_v20 = vld [vmem:[#allocation9 + $0x188] sm:$0xff]  ;;  %v662_v22 = vld [vmem:[#allocation9 + $0x178] sm:$0xff] }
  0x7c   : > { %558 = vmatprep.subr.mxu0 %v461_v35  ;;  %685 = vmatprep.subr.mxu1 %v640_v25  ;;  %v630_v35 = vld [vmem:[#allocation9 + $0x78] sm:$0xff]  ;;  %v661_v23 = vld [vmem:[#allocation9 + $0x170] sm:$0xff]  ;;  %v660_v24 = vld [vmem:[#allocation9 + $0x168] sm:$0xff] }
  0x7d   : > { %559 = vmatpush1.msra.mxu0 %v460_v36  ;;  %686 = vmatpush1.msra.mxu1 %v639_v26  ;;  %v629_v36 = vld [vmem:[#allocation9 + $0x70] sm:$0xff]  ;;  %v659_v25 = vld [vmem:[#allocation9 + $0x160] sm:$0xff]  ;;  %v658_v26 = vld [vmem:[#allocation9 + $0x158] sm:$0xff] }
  0x7e   : > { %560 = vmatprep.subr.mxu0 %v459_v37  ;;  %687 = vmatprep.subr.mxu1 %v638_v27  ;;  %v628_v37 = vld [vmem:[#allocation9 + $0x68] sm:$0xff]  ;;  %v657_v27 = vld [vmem:[#allocation9 + $0x150] sm:$0xff] }
  0x7f   : > { %561 = vmatpush1.msra.mxu0 %v458_v38  ;;  %688 = vmatpush1.msra.mxu1 %v637_v28  ;;  %v627_v38 = vld [vmem:[#allocation9 + $0x60] sm:$0xff]  ;;  %v656_v28 = vld [vmem:[#allocation9 + $0x148] sm:$0xff] }
  0x80   : > { %562 = vmatprep.subr.mxu0 %v457_v39  ;;  %689 = vmatprep.subr.mxu1 %v636_v29  ;;  %v626_v39 = vld [vmem:[#allocation9 + $0x58] sm:$0xff]  ;;  %v655_v29 = vld [vmem:[#allocation9 + $0x140] sm:$0xff] }
  0x81   : > { %563 = vmatpush1.msra.mxu0 %v456_v40  ;;  %690 = vmatpush1.msra.mxu1 %v635_v30  ;;  %v625_v40 = vld [vmem:[#allocation9 + $0x50] sm:$0xff]  ;;  %v654_v30 = vld [vmem:[#allocation9 + $0x138] sm:$0xff] }
  0x82   : > { %564 = vmatprep.subr.mxu0 %v519_v41  ;;  %691 = vmatprep.subr.mxu1 %v634_v31  ;;  %v624_v41 = vld [vmem:[#allocation9 + $0x48] sm:$0xff]  ;;  %v653_v31 = vld [vmem:[#allocation9 + $0x130] sm:$0xff] }
  0x83   : > { %565 = vmatpush2.msra.mxu0 %v518_v42  ;;  %692 = vmatpush1.msra.mxu1 %v633_v32  ;;  %v623_v42 = vld [vmem:[#allocation9 + $0x40] sm:$0xff]  ;;  %v652_v32 = vld [vmem:[#allocation9 + $0x128] sm:$0xff] }
  0x84   : > { %566 = vmatprep.subr.mxu0 %v517_v43  ;;  %693 = vmatprep.subr.mxu1 %v632_v33  ;;  %v622_v43 = vld [vmem:[#allocation9 + $0x38] sm:$0xff]  ;;  %v651_v33 = vld [vmem:[#allocation9 + $0x120] sm:$0xff] }
  0x85   : > { %567 = vmatpush2.msra.mxu0 %v516_v44  ;;  %694 = vmatpush1.msra.mxu1 %v631_v34  ;;  %v621_v44 = vld [vmem:[#allocation9 + $0x30] sm:$0xff]  ;;  %v650_v34 = vld [vmem:[#allocation9 + $0x118] sm:$0xff] }
  0x86   : > { %568 = vmatprep.subr.mxu0 %v515_v45  ;;  %695 = vmatprep.subr.mxu1 %v630_v35  ;;  %v620_v45 = vld [vmem:[#allocation9 + $0x28] sm:$0xff]  ;;  %v649_v35 = vld [vmem:[#allocation9 + $0x110] sm:$0xff] }
  0x87   : > { %569 = vmatpush2.msra.mxu0 %v514_v46  ;;  %696 = vmatpush1.msra.mxu1 %v629_v36  ;;  %v619_v46 = vld [vmem:[#allocation9 + $0x20] sm:$0xff]  ;;  %v648_v36 = vld [vmem:[#allocation9 + $0x108] sm:$0xff] }
  0x88   : > { %570 = vmatprep.subr.mxu0 %v513_v47  ;;  %697 = vmatprep.subr.mxu1 %v628_v37  ;;  %v618_v47 = vld [vmem:[#allocation9 + $0x18] sm:$0xff]  ;;  %v647_v37 = vld [vmem:[#allocation9 + $0x100] sm:$0xff] }
  0x89   : > { %571 = vmatpush2.msra.mxu0 %v512_v57  ;;  %698 = vmatpush1.msra.mxu1 %v627_v38  ;;  %v674_v57 = vld [vmem:[#allocation9 + $0x1d8] sm:$0xff] }
  0x8a   : > { %572 = vmatprep.subr.mxu0 %v511_v58  ;;  %699 = vmatprep.subr.mxu1 %v626_v39  ;;  %v673_v58 = vld [vmem:[#allocation9 + $0x1d0] sm:$0xff]  ;;  %v520_v38 = vld [vmem:[%s1523_s4] sm:$0x3] }
  0x8b   : > { %573 = vmatpush2.msra.mxu0 %v510_v59  ;;  %700 = vmatpush1.msra.mxu1 %v625_v40 }
  0x8c   : > { %574 = vmatprep.subr.mxu0 %v509_v60  ;;  %701 = vmatprep.subr.mxu1 %v624_v41 }
  0x8d   : > { %575 = vmatpush2.msra.mxu0 %v508_v61  ;;  %702 = vmatpush1.msra.mxu1 %v623_v42 }
  0x8e   : > { %576 = vmatprep.subr.mxu0 %v507_v62  ;;  %703 = vmatprep.subr.mxu1 %v622_v43  ;;  %v425_v62 = vshrl.u32 %v393_v0, 7 }
  0x8f   : > { %577 = vmatpush2.msra.mxu0 %v506_v63  ;;  %704 = vmatpush1.msra.mxu1 %v621_v44 }
  0x90   : > { %578 = vmatprep.subr.mxu0 %v505_v1  ;;  %705 = vmatprep.subr.mxu1 %v620_v45  ;;  %v1454_v63 = vsub.s32 0, %v425_v62  ;;  %v1456_v1 = vsub.s32 1, %v425_v62 }
  0x91   : > { %579 = vmatpush2.msra.mxu0 %v504_v2  ;;  %706 = vmatpush1.msra.mxu1 %v619_v46  ;;  %v422_v2 = vld [vmem:[#allocation6] sm:$0x3] }
  0x92   : > { %707 = vmatprep.subr.mxu1 %v618_v47  ;;  %v525_v39 = vrot.slane %v520_v38, %v1454_v63  ;;  %v529_v40 = vrot.slane %v520_v38, %v1456_v1 }
  0xf3   : > { %v406_v48 = vpop.xlane.xlu0 %405 }
  0xf4   : > { %v407_v49 = vmul.f32 0.03125, %v406_v48  ;;  %v617_v48 = vld [vmem:[#allocation9 + $0x10] sm:$0xff] }
  0xf5   : > { %708 = vmatpush1.msra.mxu1 %v617_v48 }
  0xf6   : > { %v408_v50 = vsub.f32 %v1435_v4, %v407_v49  ;;  %v409_v51 = vsub.f32 %v1437_v5, %v407_v49  ;;  %v502_v4 = vld [vmem:[#allocation8 + $0x170] sm:$0xff]  ;;  %v501_v5 = vld [vmem:[#allocation8 + $0x168] sm:$0xff] }
  0xf7   : > { %v616_v49 = vld [vmem:[#allocation9 + $0x8] sm:$0xff] }
  0xf8   : > { %v1445_v52 = vmul.f32 %v1433_v3, %v408_v50  ;;  %v1447_v53 = vmul.f32 0.0, %v409_v51  ;;  %v503_v3 = vld [vmem:[#allocation8 + $0x178] sm:$0xff]  ;;  %v615_v50 = vld [vmem:[#allocation9] sm:$0xff]  ;;  %709 = vmatprep.subr.mxu1 %v616_v49 }
  0xf9   : > { %580 = vmatprep.subr.mxu0 %v503_v3  ;;  %v678_v51 = vld [vmem:[#allocation9 + $0x1f8] sm:$0xff]  ;;  %710 = vmatpush1.msra.mxu1 %v615_v50 }
  0xfa   : > { %v412_v54 = vmul.f32 %v1445_v52, %v1445_v52  ;;  %v413_v55 = vmul.f32 %v1447_v53, %v1447_v53  ;;  %581 = vmatpush2.msra.mxu0 %v502_v4  ;;  %711 = vmatprep.subr.mxu1 %v678_v51  ;;  %v436_v3 = vld [vmem:[%s1521_s2] sm:$0x3]  ;;  %v427_v4 = vrot.slane %v422_v2, %v1454_v63 }
  0xfb   : > { %582 = vmatprep.subr.mxu0 %v501_v5  ;;  %v431_v5 = vrot.slane %v422_v2, %v1456_v1  ;;  %v445_v0 = vrot.slane %v436_v3, %v1456_v1 }
  0xfc   : > { %v414_v56 = vadd.f32 %v413_v55, %v412_v54  ;;  %583 = vmatpush2.msra.mxu0 %v500_v6  ;;  %v677_v54 = vld [vmem:[#allocation9 + $0x1f0] sm:$0xff]  ;;  %v676_v55 = vld [vmem:[#allocation9 + $0x1e8] sm:$0xff] }
  0xfd   : > { %584 = vmatprep.subr.mxu0 %v499_v7  ;;  %712 = vmatpush2.msra.mxu1 %v677_v54 }
  0xfe   : > { %415 = vadd.xlane.f32.xlu0 %v414_v56  ;;  %585 = vmatpush2.msra.mxu0 %v498_v8  ;;  %v675_v56 = vld [vmem:[#allocation9 + $0x1e0] sm:$0xff]  ;;  %v441_v8 = vrot.slane %v436_v3, %v1454_v63 }
  0xff   : > { %586 = vmatprep.subr.mxu0 %v497_v9  ;;  %713 = vmatprep.subr.mxu1 %v676_v55 }
 0x100   : > { %587 = vmatpush2.msra.mxu0 %v496_v10  ;;  %714 = vmatpush2.msra.mxu1 %v675_v56 }
 0x101   : > { %588 = vmatprep.subr.mxu0 %v495_v11  ;;  %715 = vmatprep.subr.mxu1 %v674_v57  ;;  %v759_v57 = vld [vmem:[%s1525_s6] sm:$0x3] }
 0x102   : > { %589 = vmatpush2.msra.mxu0 %v494_v12  ;;  %716 = vmatpush2.msra.mxu1 %v673_v58  ;;  %v764_v58 = vrot.slane %v759_v57, %v1454_v63 }
 0x103   : > { %590 = vmatprep.subr.mxu0 %v493_v13 }
 0x104   : > { %591 = vmatpush2.msra.mxu0 %v492_v14  ;;  %v672_v14 = vld [vmem:[#allocation9 + $0x1c8] sm:$0xff] }
 0x105   : > { %592 = vmatprep.subr.mxu0 %v491_v15  ;;  %717 = vmatprep.subr.mxu1 %v672_v14  ;;  %v671_v15 = vld [vmem:[#allocation9 + $0x1c0] sm:$0xff] }
 0x106   : > { %593 = vmatpush2.msra.mxu0 %v490_v16  ;;  %718 = vmatpush2.msra.mxu1 %v671_v15  ;;  %v670_v16 = vld [vmem:[#allocation9 + $0x1b8] sm:$0xff] }
 0x107   : > { %594 = vmatprep.subr.mxu0 %v489_v17  ;;  %719 = vmatprep.subr.mxu1 %v670_v16  ;;  %v669_v17 = vld [vmem:[#allocation9 + $0x1b0] sm:$0xff] }
 0x108   : > { %595 = vmatpush2.msra.mxu0 %v488_v18  ;;  %720 = vmatpush2.msra.mxu1 %v669_v17  ;;  %v667_v18 = vld [vmem:[#allocation9 + $0x1a0] sm:$0xff] }
 0x187   : > { %v416_v59 = vpop.xlane.xlu0 %415 }
 0x188   : > { %v417_v60 = vmul.f32 0.03125, %v416_v59 }
 0x18a   : > { %v418_v61 = vadd.f32 1e-05, %v417_v60  ;;  %v768_v60 = vrot.slane %v759_v57, %v1456_v1 }
 0x18c   : > { %1034 = vrsqrt.f32 %v418_v61 }
 0x199   : > { %v1035_v6 = vpop.eup %1034 }
 0x19a   : > { %v421_v7 = vmul.f32 %v1035_v6, %v1447_v53  ;;  %v420_v9 = vmul.f32 %v1035_v6, %v1445_v52  ;;  %v668_v53 = vld [vmem:[#allocation9 + $0x1a8] sm:$0xff]  ;;  %v665_v52 = vld [vmem:[#allocation9 + $0x190] sm:$0xff] }
 0x19b   : > { %721 = vmatprep.subr.mxu1 %v668_v53 }
 0x19c   : > { %v435_v10 = vmul.f32 %v431_v5, %v421_v7  ;;  %v434_v11 = vmul.f32 %v427_v4, %v420_v9  ;;  %722 = vmatpush2.msra.mxu1 %v667_v18 }
 0x19d   : > { %723 = vmatprep.subr.mxu1 %v666_v19 }
 0x19e   : > { %v449_v12 = vadd.f32 %v445_v0, %v435_v10  ;;  %v448_v13 = vadd.f32 %v441_v8, %v434_v11  ;;  %724 = vmatpush2.msra.mxu1 %v665_v52 }
 0x19f   : > { %725 = vmatprep.subr.mxu1 %v664_v20 }
 0x1a0   : > { %596 = vmatprep.mubr.f32.mxu0 %v449_v12  ;;  %726 = vmatpush2.msra.mxu1 %v663_v21 }
 0x1a1   : > { %597 = vmatmul.mubr.f32.vlgmr.msra.gmra.mxu0 %v448_v13  ;;  %727 = vmatprep.subr.mxu1 %v662_v22 }
 0x1a2   : > { %728 = vmatpush2.msra.mxu1 %v661_v23 }
 0x1a3   : > { %729 = vmatprep.subr.mxu1 %v660_v24 }
 0x1a4   : > { %730 = vmatpush2.msra.mxu1 %v659_v25 }
 0x1a5   : > { %731 = vmatprep.subr.mxu1 %v658_v26 }
 0x1a6   : > { %732 = vmatpush2.msra.mxu1 %v657_v27 }
 0x1a7   : > { %733 = vmatprep.subr.mxu1 %v656_v28 }
 0x1a8   : > { %734 = vmatpush2.msra.mxu1 %v655_v29 }
 0x1a9   : > { %735 = vmatprep.subr.mxu1 %v654_v30 }
 0x1aa   : > { %736 = vmatpush2.msra.mxu1 %v653_v31 }
 0x1ab   : > { %737 = vmatprep.subr.mxu1 %v652_v32 }
 0x1ac   : > { %738 = vmatpush2.msra.mxu1 %v651_v33 }
 0x1ad   : > { %739 = vmatprep.subr.mxu1 %v650_v34 }
 0x1ae   : > { %740 = vmatpush2.msra.mxu1 %v649_v35 }
 0x1af   : > { %741 = vmatprep.subr.mxu1 %v648_v36 }
 0x1b0   : > { %742 = vmatpush2.msra.mxu1 %v647_v37 }
 0x261   : > { %v598_v41 = vpop.f32.mrf.mxu0 }
 0x262   : > { %v599_v42 = vadd.f32 %v598_v41, %v525_v39 }
 0x263   : > { %v600_v43 = vpop.f32.mrf.mxu0 }
 0x264   : > { %v605_v44 = vmul.f32 0.70710677, %v599_v42  ;;  %v601_v45 = vadd.f32 %v600_v43, %v529_v40  ;;  %v603_v54 = vmul.f32 0.5, %v599_v42 }
 0x266   : > { %1036 = verf.f32 %v605_v44  ;;  %v606_v46 = vmul.f32 0.70710677, %v601_v45  ;;  %v604_v50 = vmul.f32 0.5, %v601_v45 }
 0x268   : > { %1038 = verf.f32 %v606_v46 }
 0x273   : > { %v1037_v47 = vpop.eup %1036 }
 0x274   : > { %v609_v49 = vadd.f32 1.0, %v1037_v47 }
 0x275   : > { %v1039_v48 = vpop.eup %1038 }
 0x276   : > { %v610_v51 = vadd.f32 1.0, %v1039_v48  ;;  %v611_v56 = vmul.f32 %v609_v49, %v603_v54 }
 0x278   : > { %v612_v55 = vmul.f32 %v610_v51, %v604_v50 }
 0x27a   : > { %743 = vmatprep.mubr.f32.mxu1 %v612_v55 }
 0x27b   : > { %744 = vmatmul.mubr.f32.vlgmr.msra.gmra.mxu1 %v611_v56 }
 0x33b   : > { %v745_v59 = vpop.f32.mrf.mxu1 }
 0x33c   : > { %v771_v62 = vadd.f32 %v764_v58, %v745_v59 }
 0x33d   : > { %v747_v61 = vpop.f32.mrf.mxu1 }
 0x33e   : > { %v772_v2 = vadd.f32 %v768_v60, %v747_v61  ;;  %773 = vst [vmem:[%s379_s21] sm:$0xff] %v771_v62 }
 0x340   : > { %774 = vst [vmem:[%s379_s21 + $0x8] sm:$0xff] %v772_v2 }
 0x341   : > { %1159 = shalt.err (!%p1156_p2)
}
 0x342   : > { %s1160_s3 = scalar_lea.hbm %s788_s8, 256  ;;  %s1164_s11 = scalar_lea.hbm %s1526_s7, 512 }
 0x343   : > { %p1161_p8 = scmp.ne.s32.totalorder %s788_s8, %s1160_s3  ;;  %p1165_p10 = scmp.lt.s32.totalorder %s788_s8, %s1526_s7 }
 0x344   : > { %p1166_p0 = scmp.lt.s32.totalorder %s1164_s11, %s1160_s3 }
 0x345   : > { %p1162_p12 = pnand %p1161_p8, %p1384_p13 }
 0x346   : > { %p1167_p9 = por %p1166_p0, %p1165_p10 }
 0x347   : > { %p1163_p7 = pneg %p1162_p12 }
 0x349   : > { %p1168_p1 = pnand %p1167_p9, %p1163_p7 }
 0x34b   : > { %1171 = shalt.err (!%p1168_p1)
}
 0x34c   : > { %952 = dma.vmem_to_hbm [thread:$0]  (%p1384_p13), %s791_s22, 256, %s788_s8, %s776_s19  }
 0x34d PF: > { %s802_s10 = sand.u32 1, %s1214_s24   ;;  %p1549_p11 = scmp.ne.s32.totalorder %s1537_s12, 0 }
 0x34e   : > { %p1550_p6 = scmp.ge.s32.totalorder %s1234_s29, 2  ;;  %s803_s21 = scalar_lea.sflag [#allocation5], %s802_s10 }
 0x350   : > { %p969_p3 = pnand %p1550_p6, %p1549_p11 }
 0x352   : > { %p970_p5 = pneg %p969_p3 }
 0x354   : > { %1209 = dma.done.wait (%p970_p5), %s803_s21, 256  }
 0x355   : > { %1211 = vsyncadd (%p970_p5), %s803_s21, 4294967040  ;;  %s25_s29 = sadd.s32 1, %s1234_s29   ;;  %s1551_s24 = smov %s1218_s25 }
 0x356   : > { %p22_p4 = scmp.ge.s32.totalorder %s25_s29, 4   ;;  %s1552_s25 = smov %s1222_s26 }
 0x357   : > { %s1553_s26 = smov %s1396_s14  ;;  %s1554_s27 = smov %s1230_s28 }
 0x358   : > { %s1555_s28 = smov %s1557_s23  ;;  %24 = sbr.rel (!%p22_p4) target bundleno = 12 (0xc), region = 118 }
 0x35d   :  { %808 = vsyncpa [#allocation4], 1 }
 0x35e   :  { %810 = vsyncpa [#allocation4 + $0x1], 1 }
 0x35f   :  { %811 = vsyncpa [#allocation7], 1 }
 0x360   :  { %812 = vsyncpa [#allocation10], 1 }
 0x361   :  { %813 = vsyncpa [#allocation5], 1 }
 0x362   :  { %815 = vsyncpa [#allocation5 + $0x1], 1 }

</bundles_post_ra>
